<compile_context>
chip_gen: v6e
topology: v6e:2x2x1
jax: 0.10.0
libtpu: 0.0.40
codegen_flags: <defaults>
</compile_context>

<pallas_src>
import jax
import jax.numpy as jnp
from jax import lax
from jax.experimental import pallas as pl
from jax.experimental.pallas import tpu as pltpu

EPS = 1e-5


def _layernorm_kernel(x_ref, w_ref, o_ref):
    # x_ref: (tile_rows, D) input dtype; w_ref: (1, D) f32 (whole array, VMEM resident);
    # o_ref: (tile_rows, D) out dtype (f32 by default).
    x = x_ref[...].astype(jnp.float32)
    inv_d = jnp.float32(1.0 / x.shape[-1])
    mean = jnp.sum(x, axis=-1, keepdims=True) * inv_d
    centered = x - mean
    var = jnp.sum(centered * centered, axis=-1, keepdims=True) * inv_d
    inv = lax.rsqrt(var + EPS)
    o_ref[...] = (centered * inv * w_ref[...]).astype(o_ref.dtype)


def _round_up(n, m):
    return ((n + m - 1) // m) * m


def layer_norm_pallas(x, weight, *, tile_rows=None, vmem_budget_bytes=20 << 20,
                      out_dtype=jnp.float32):
    """x: (B, S, D) any float dtype; weight: (D,). Returns (B, S, D) in out_dtype (f32 default)."""
    B, S, D = x.shape
    rows = B * S
    x2 = x.reshape(rows, D)
    w2 = weight.reshape(1, D).astype(jnp.float32)

    in_bytes = x2.dtype.itemsize
    out_bytes = jnp.dtype(out_dtype).itemsize
    # Sublane packing: f32 -> 8 rows per vreg, bf16/f16 -> 16, int8/fp8 -> 32.
    row_align = max(8, 32 // in_bytes)

    # Per-row VMEM footprint:
    #   2 * D * (in_bytes + out_bytes)  -- double-buffered input + output blocks
    #   2 * D * 4                       -- in-kernel f32 temporaries (x_f32, centered)
    per_row_bytes = 2 * D * (in_bytes + out_bytes) + 2 * D * 4

    # Keep the total well under v7x's 64 MiB/TC; v5e/v6e (128 MiB) are not the constraint.
    budget = min(vmem_budget_bytes, 40 << 20)
    if tile_rows is None:
        tr = max(row_align, budget // per_row_bytes)
        tr = (tr // row_align) * row_align
    else:
        tr = _round_up(max(tile_rows, row_align), row_align)
    # Don't make the tile bigger than the (aligned) row count.
    tr = min(tr, _round_up(rows, row_align))

    # Partial last block (rows % tr != 0) is handled by Pallas boundary masking:
    # OOB reads only feed rows whose writes are dropped, so no host-side pad/slice.
    grid = (pl.cdiv(rows, tr),)

    # VMEM limit from actual usage + slack, never the full 64 MiB of a v7x TC.
    vmem_need = tr * per_row_bytes + D * 4 + (4 << 20)
    vmem_limit = int(min(max(vmem_need, 16 << 20), 48 << 20))

    out = pl.pallas_call(
        _layernorm_kernel,
        out_shape=jax.ShapeDtypeStruct((rows, D), out_dtype),
        grid_spec=pltpu.PrefetchScalarGridSpec(
            num_scalar_prefetch=0,
            grid=grid,
            in_specs=[
                pl.BlockSpec((tr, D), lambda i: (i, 0)),
                # Whole weight resident in VMEM for the entire kernel; no per-step DMA.
                pl.BlockSpec(memory_space=pltpu.MemorySpace.VMEM),
            ],
            out_specs=pl.BlockSpec((tr, D), lambda i: (i, 0)),
        ),
        compiler_params=pltpu.CompilerParams(
            # Only buys anything on v7x (2 TCs/chip); no-op on v5e/v6e.
            dimension_semantics=("parallel",),
            vmem_limit_bytes=vmem_limit,
        ),
    )(x2, w2)

    return out.reshape(B, S, D)


def layer_norm_ref(x, weight):
    xf = x.astype(jnp.float32)
    mean = jnp.mean(xf, axis=-1, keepdims=True)
    var = jnp.mean((xf - mean) ** 2, axis=-1, keepdims=True)
    y = (xf - mean) * lax.rsqrt(var + EPS)
    return y * weight[None, None, :].astype(jnp.float32)


if __name__ == "__main__":
    key = jax.random.PRNGKey(0)
    batch, seq, dim = 2, 8, 32

    kx, kw = jax.random.split(key)
    x = jax.random.normal(kx, (batch, seq, dim), dtype=jnp.float32)
    # nn.Parameter(torch.ones([dim])) — deterministic init; perturb slightly so the scale matters.
    weight = jnp.ones((dim,), dtype=jnp.float32) + 0.01 * jax.random.normal(
        kw, (dim,), dtype=jnp.float32
    )

    out = jax.block_until_ready(layer_norm_pallas(x, weight))
    ref = layer_norm_ref(x, weight)
    assert out.shape == (batch, seq, dim)
    assert out.dtype == jnp.float32
    assert jnp.allclose(out, ref, atol=1e-5, rtol=1e-5)

    # Extra check: a row count that is NOT a multiple of the tile (exercises the
    # partial-block masking path, no host pad/slice) and a bf16 input (exercises
    # sublane alignment / f32 accumulation).
    x_odd = jax.random.normal(jax.random.PRNGKey(1), (3, 7, dim), dtype=jnp.bfloat16)
    out_odd = jax.block_until_ready(layer_norm_pallas(x_odd, weight))
    ref_odd = layer_norm_ref(x_odd, weight)
    assert out_odd.dtype == jnp.float32
    assert jnp.allclose(out_odd, ref_odd, atol=1e-2, rtol=1e-2)

    print("KERNEL_OK")
</pallas_src>

<mosaic_0001>
module attributes {stable_mosaic.version = 11 : i64} {
  func.func @_layernorm_kernel(%arg0: i32, %arg1: memref<16x32xf32, #tpu.memory_space<vmem>>, %arg2: memref<1x32xf32, #tpu.memory_space<vmem>>, %arg3: memref<16x32xf32, #tpu.memory_space<vmem>>) attributes {dimension_semantics = [#tpu.dimension_semantics<parallel>], iteration_bounds = array<i64: 1>, scalar_prefetch = 0 : i64, scratch_operands = 0 : i64, tpu.core_type = #tpu.core_type<tc>, window_params = [{transform_indices = @transform_0, window_bounds = array<i64: 16, 32>}, {pipeline_mode = #tpu.pipeline_mode<synchronous>, transform_indices = @transform_1, window_bounds = array<i64: 1, 32>}, {transform_indices = @transform_2, window_bounds = array<i64: 16, 32>}]} {
    %c0 = arith.constant 0 : index
    %c0_0 = arith.constant 0 : index
    %0 = vector.load %arg1[%c0, %c0_0] : memref<16x32xf32, #tpu.memory_space<vmem>>, vector<16x32xf32>
    %cst = arith.constant dense<0.000000e+00> : vector<16xf32>
    %1 = vector.multi_reduction <add>, %0, %cst [1] : vector<16x32xf32> to vector<16xf32>
    %2 = vector.shape_cast %1 : vector<16xf32> to vector<16x1xf32>
    %cst_1 = arith.constant 3.125000e-02 : f32
    %3 = vector.broadcast %cst_1 : f32 to vector<16x1xf32>
    %4 = arith.mulf %2, %3 : vector<16x1xf32>
    %5 = vector.broadcast %4 : vector<16x1xf32> to vector<16x32xf32>
    %6 = arith.subf %0, %5 : vector<16x32xf32>
    %7 = arith.mulf %6, %6 : vector<16x32xf32>
    %cst_2 = arith.constant dense<0.000000e+00> : vector<16xf32>
    %8 = vector.multi_reduction <add>, %7, %cst_2 [1] : vector<16x32xf32> to vector<16xf32>
    %9 = vector.shape_cast %8 : vector<16xf32> to vector<16x1xf32>
    %cst_3 = arith.constant 3.125000e-02 : f32
    %10 = vector.broadcast %cst_3 : f32 to vector<16x1xf32>
    %11 = arith.mulf %9, %10 : vector<16x1xf32>
    %cst_4 = arith.constant 9.99999974E-6 : f32
    %12 = vector.broadcast %cst_4 : f32 to vector<16x1xf32>
    %13 = arith.addf %11, %12 : vector<16x1xf32>
    %14 = math.rsqrt %13 : vector<16x1xf32>
    %15 = vector.broadcast %14 : vector<16x1xf32> to vector<16x32xf32>
    %16 = arith.mulf %6, %15 : vector<16x32xf32>
    %c0_5 = arith.constant 0 : index
    %c0_6 = arith.constant 0 : index
    %17 = vector.load %arg2[%c0_5, %c0_6] : memref<1x32xf32, #tpu.memory_space<vmem>>, vector<1x32xf32>
    %18 = vector.broadcast %17 : vector<1x32xf32> to vector<16x32xf32>
    %19 = arith.mulf %16, %18 : vector<16x32xf32>
    %c0_7 = arith.constant 0 : index
    %c0_8 = arith.constant 0 : index
    %20 = vector.load %arg3[%c0_7, %c0_8] : memref<16x32xf32, #tpu.memory_space<vmem>>, vector<16x32xf32>
    tpu.vector_store %arg3[%c0_7, %c0_8], %19 {strides = array<i32>} : memref<16x32xf32, #tpu.memory_space<vmem>>, vector<16x32xf32>,
    return
  }
  func.func @transform_0(%arg0: i32) -> (i32, i32) {
    %c0_i32 = arith.constant 0 : i32
    %c0_i32_0 = arith.constant 0 : i32
    return %arg0, %c0_i32 : i32, i32
  }
  func.func @transform_1(%arg0: i32) -> (i32, i32) {
    %c0_i32 = arith.constant 0 : i32
    %c0_i32_0 = arith.constant 0 : i32
    %c0_i32_1 = arith.constant 0 : i32
    return %c0_i32, %c0_i32_0 : i32, i32
  }
  func.func @transform_2(%arg0: i32) -> (i32, i32) {
    %c0_i32 = arith.constant 0 : i32
    %c0_i32_0 = arith.constant 0 : i32
    return %arg0, %c0_i32 : i32, i32
  }
}

</mosaic_0001>

<bundles_post_ra>
// kernel: tpu_custom_call.1
= control target key start
LH: loop header
LB: loop body
LE: loop exit
PB: predicated region body
PF: predicated region fallthrough
CT: control target
= control target key end

     0   :  { %7 = vsyncpa [#allocation3], 0  ;;  %s176_s0 = inlined_call_operand.hbm [shape: f32[16,32], index: 0, kind: input, shape index: {}]   ;;  %s177_s1 = inlined_call_operand.vmem [shape: f32[1,32], index: 1, kind: input, shape index: {}]   ;;  %s178_s2 = inlined_call_operand.hbm [shape: f32[16,32], index: 2, kind: output, shape index: {}]  }
   0x1   :  { %8 = vsyncpa [#allocation4], 0  ;;  %s136_s9 = smov [#allocation2]  }
   0x2   :  { %s14_s10 = sshll.u32 %s136_s9, 4  ;;  %s15_s10 = int_to_ptr.vmem [resolvable:$true] %s14_s10 }
   0x3   :  { %s100_s11 = scalar_lea.vmem %s15_s10, 256  ;;  %p105_p1 = scmp.lt.s32.totalorder %s15_s10, %s15_s10 }
   0x4   :  { %p101_p0 = scmp.ne.s32.totalorder %s15_s10, %s100_s11  ;;  %p106_p2 = scmp.lt.s32.totalorder %s100_s11, %s100_s11 }
   0x6   :  { %p107_p3 = por %p106_p2, %p105_p1 }
   0x8   :  { %p108_p4 = pnand %p107_p3, %p101_p0 }
   0xa   :  { %111 = shalt.err (!%p108_p4)
}
   0xb   :  { %s137_s12 = smov 128   ;;  %s138_s13 = smov 8  }
   0xc   :  { %20 = dma.hbm_to_vmem [thread:$0]  %s176_s0, 256, %s15_s10, [#allocation3], %s137_s12, %s137_s12, %s138_s13  }
   0xd   :  { %132 = dma.done.wait [#allocation3], 256  }
   0xe   :  { %133 = vsyncadd [#allocation3], 4294967040  ;;  %vm28_vm0 = vcmask 261120   ;;  %v26_v0 = vld [vmem:[#allocation2] sm:$0xff]  ;;  %v27_v1 = vld [vmem:[#allocation2 + $0x8] sm:$0xff]  ;;  %s139_s17 = smov [#allocation5]  }
   0xf   :  { %v29_v2 = vsel %vm28_vm0, %v26_v0, 0.0  ;;  %v32_v3 = vsel %vm28_vm0, %v27_v1, 0.0  ;;  %v83_v21 = vld [vmem:[%s177_s1] ss:$0 sm:$0xff]  ;;  %s71_s18 = sshll.u32 %s139_s17, 4  ;;  %s72_s18 = int_to_ptr.vmem [resolvable:$true] %s71_s18 }
  0x10   :  { %30 = vadd.xlane.f32.xlu0 %v29_v2  ;;  %s112_s19 = scalar_lea.vmem %s72_s18, 256  ;;  %p117_p6 = scmp.lt.s32.totalorder %s72_s18, %s72_s18 }
  0x11   :  { %p113_p5 = scmp.ne.s32.totalorder %s72_s18, %s112_s19  ;;  %p118_p7 = scmp.lt.s32.totalorder %s112_s19, %s112_s19 }
  0x13   :  { %p119_p8 = por %p118_p7, %p117_p6 }
  0x14   :  { %33 = vadd.xlane.f32.xlu0 %v32_v3 }
  0x15   :  { %p120_p9 = pnand %p119_p8, %p113_p5 }
  0x99   :  { %v31_v4 = vpop.xlane.xlu0 %30 }
  0x9a   :  { %v35_v5 = vmul.f32 0.03125, %v31_v4 }
  0x9c   :  { %v37_v6 = vsub.f32 %v26_v0, %v35_v5 }
  0x9d   :  { %v34_v7 = vpop.xlane.xlu0 %33 }
  0x9e   :  { %v36_v8 = vmul.f32 0.03125, %v34_v7  ;;  %v39_v9 = vmul.f32 %v37_v6, %v37_v6 }
  0xa0   :  { %v38_v10 = vsub.f32 %v27_v1, %v36_v8  ;;  %v41_v11 = vsel %vm28_vm0, %v39_v9, 0.0 }
  0xa1   :  { %42 = vadd.xlane.f32.xlu1 %v41_v11 }
  0xa2   :  { %v40_v12 = vmul.f32 %v38_v10, %v38_v10 }
  0xa4   :  { %v44_v13 = vsel %vm28_vm0, %v40_v12, 0.0 }
  0xa5   :  { %45 = vadd.xlane.f32.xlu1 %v44_v13 }
 0x12a   :  { %v43_v14 = vpop.xlane.xlu1 %42 }
 0x12b   :  { %v47_v15 = vmul.f32 0.03125, %v43_v14 }
 0x12d   :  { %v49_v16 = vadd.f32 1e-05, %v47_v15 }
 0x12e   :  { %v46_v17 = vpop.xlane.xlu1 %45 }
 0x12f   :  { %88 = vrsqrt.f32 %v49_v16  ;;  %v48_v18 = vmul.f32 0.03125, %v46_v17 }
 0x131   :  { %v50_v19 = vadd.f32 1e-05, %v48_v18 }
 0x133   :  { %90 = vrsqrt.f32 %v50_v19 }
 0x13c   :  { %v89_v20 = vpop.eup %88 }
 0x13d   :  { %v53_v22 = vmul.f32 %v89_v20, %v37_v6 }
 0x13f   :  { %v62_v23 = vmul.f32 %v83_v21, %v53_v22 }
 0x140   :  { %v91_v24 = vpop.eup %90 }
 0x141   :  { %v54_v25 = vmul.f32 %v91_v24, %v38_v10  ;;  %64 = vst.msk [vmem:[#allocation5] sm:$0xff] %vm28_vm0, %v62_v23 }
 0x143   :  { %v63_v26 = vmul.f32 %v83_v21, %v54_v25 }
 0x145   :  { %65 = vst.msk [vmem:[#allocation5 + $0x8] sm:$0xff] %vm28_vm0, %v63_v26 }
 0x146   :  { %123 = shalt.err (!%p120_p9)
}
 0x147   :  { %77 = dma.vmem_to_hbm [thread:$0]  %s72_s18, 256, %s178_s2, [#allocation4], %s137_s12, %s137_s12, %s138_s13  }
 0x148   :  { %134 = dma.done.wait [#allocation4], 256  }
 0x149   :  { %135 = vsyncadd [#allocation4], 4294967040 }
 0x14a   :  { %81 = vsyncpa [#allocation3], 1 }
 0x14b   :  { %82 = vsyncpa [#allocation4], 1 }

</bundles_post_ra>
